<compile_context>
chip_gen: v6e
topology: v6e:2x2x1
jax: 0.10.0
libtpu: 0.0.40
codegen_flags: <defaults>
</compile_context>

<pallas_src>
import functools

import jax
import jax.numpy as jnp
from jax.experimental import pallas as pl
from jax.experimental.pallas import tpu as pltpu


def _round_up(x, m):
    return (x + m - 1) // m * m


def _sublane_multiple(dtype):
    # Sub-32-bit dtypes pack along sublanes: 8 rows for 4-byte, 16 for 2-byte,
    # 32 for 1-byte element types.
    return max(8, 32 // jnp.dtype(dtype).itemsize)


def _vmem_limit_bytes():
    # Scoped-VMEM limit derived from the physical VMEM of the local chip:
    #   v5e/v6e (128 MiB physical) -> 64 MiB, v7x (64 MiB physical) -> 48 MiB.
    phys = 128 * 1024 * 1024
    try:
        info = pltpu.get_tpu_info()
        phys = int(getattr(info, "vmem_capacity_bytes", phys))
    except Exception:
        pass
    return int(min(phys * 3 // 4, 64 * 1024 * 1024))


def _hloss_kernel(x_ref, o_ref, *, n_rows, tn, needs_mask):
    # x_ref: (TN, C) block in VMEM; o_ref: (1, 1) resident accumulator in SMEM.
    i = pl.program_id(0)
    last = pl.num_programs(0) - 1

    @pl.when(i == 0)
    def _init():
        o_ref[0, 0] = jnp.float32(0.0)

    x = x_ref[...].astype(jnp.float32)                       # (TN, C)
    m = jnp.max(x, axis=1, keepdims=True)                    # (TN, 1)
    z = x - m
    e = jnp.exp(z)                                           # single exp / element
    sum_e = jnp.sum(e, axis=1, keepdims=True)                # (TN, 1)
    sum_ez = jnp.sum(e * z, axis=1, keepdims=True)           # (TN, 1)
    ent = jnp.log(sum_e) - sum_ez / sum_e                    # per-row entropy

    if needs_mask:
        # Only the final (partial) block can contain out-of-range rows, so the
        # iota/compare/select only exists on that step.
        @pl.when(i != last)
        def _acc_full():
            o_ref[0, 0] += jnp.sum(ent)

        @pl.when(i == last)
        def _acc_masked():
            row = i * tn + jax.lax.broadcasted_iota(jnp.int32, ent.shape, 0)
            o_ref[0, 0] += jnp.sum(jnp.where(row < n_rows, ent, 0.0))
    else:
        o_ref[0, 0] += jnp.sum(ent)

    @pl.when(i == last)
    def _finalize():
        o_ref[0, 0] = o_ref[0, 0] / jnp.float32(n_rows)


def _hloss_prior_kernel(x_ref, q_ref, o_ref, *, n_rows, tn, needs_mask, log_prior):
    # x_ref: (TN, C); q_ref: (TN, C) raw prior (log_prior=True) or (1, C)
    # precomputed log-prior (log_prior=False); o_ref: (1, 1) SMEM accumulator.
    i = pl.program_id(0)
    last = pl.num_programs(0) - 1

    @pl.when(i == 0)
    def _init():
        o_ref[0, 0] = jnp.float32(0.0)

    x = x_ref[...].astype(jnp.float32)
    q = q_ref[...].astype(jnp.float32)
    lq = jnp.log(q) if log_prior else q                      # EUP has slack

    m = jnp.max(x, axis=1, keepdims=True)
    z = x - m
    e = jnp.exp(z)
    sum_e = jnp.sum(e, axis=1, keepdims=True)
    # -sum(p * (logp - log q)) = lse + sum(e * (log q - z)) / sum(e)
    num = jnp.sum(e * (lq - z), axis=1, keepdims=True)
    val = jnp.log(sum_e) + num / sum_e                       # (TN, 1)

    if needs_mask:
        @pl.when(i != last)
        def _acc_full():
            o_ref[0, 0] += jnp.sum(val)

        @pl.when(i == last)
        def _acc_masked():
            row = i * tn + jax.lax.broadcasted_iota(jnp.int32, val.shape, 0)
            o_ref[0, 0] += jnp.sum(jnp.where(row < n_rows, val, 0.0))
    else:
        o_ref[0, 0] += jnp.sum(val)

    @pl.when(i == last)
    def _finalize():
        o_ref[0, 0] = o_ref[0, 0] / jnp.float32(n_rows)


def hloss(x, prior=None, *, block_rows=None):
    """Pallas implementation of HLoss.forward. Returns a scalar float32."""
    N, C = x.shape
    x_isz = jnp.dtype(x.dtype).itemsize
    sublane = _sublane_multiple(x.dtype)

    vmem_limit = _vmem_limit_bytes()

    # Per-row VMEM footprint: 2x native-dtype x block (double buffering) plus
    # ~4 f32 blocks of in-kernel temporaries (x_f32, z, e, e*z / e*(lq-z)).
    per_row = C * (2 * x_isz + 4 * 4)

    tiled_prior = False
    prior2d = None
    if prior is not None:
        prior2d = jnp.reshape(prior, (-1, C))
        P = prior2d.shape[0]
        if P != 1:
            assert P == N, "prior must reshape to (1, C) or (N, C)"
            tiled_prior = True
            p_isz = jnp.dtype(prior2d.dtype).itemsize
            per_row += C * (2 * p_isz + 2 * 4)               # prior stream + lq temps
            sublane = max(sublane, _sublane_multiple(prior2d.dtype))

    if block_rows is None:
        budget = (vmem_limit * 3) // 4                       # headroom under the limit
        tn_cap = max(sublane, (budget // max(per_row, 1)) // sublane * sublane)
    else:
        tn_cap = max(sublane, block_rows // sublane * sublane)

    if N <= tn_cap:
        tn = N                                               # single block, full dim
        needs_mask = False
    else:
        tn = tn_cap                                          # sublane multiple <= N
        needs_mask = (N % tn) != 0                           # only last block partial
    grid = (pl.cdiv(N, tn),)

    compiler_params = pltpu.CompilerParams(
        dimension_semantics=("arbitrary",),                  # accumulating row axis
        vmem_limit_bytes=vmem_limit,
    )
    x_spec = pl.BlockSpec((tn, C), lambda i: (i, 0))
    out_spec = pl.BlockSpec((1, 1), lambda i: (0, 0), memory_space=pltpu.SMEM)
    out_shape = jax.ShapeDtypeStruct((1, 1), jnp.float32)

    if prior is None:
        kern = functools.partial(_hloss_kernel, n_rows=N, tn=tn, needs_mask=needs_mask)
        out = pl.pallas_call(
            kern,
            out_shape=out_shape,
            grid=grid,
            in_specs=[x_spec],
            out_specs=out_spec,
            compiler_params=compiler_params,
        )(x)
    else:
        if tiled_prior:
            # Stream raw prior in its native dtype; log() happens in-kernel, so no
            # extra HBM pass materializing a full f32 log(prior) array.
            q_in = prior2d
            q_spec = pl.BlockSpec((tn, C), lambda i: (i, 0))
            log_prior = True
        else:
            # Tiny (1, C) prior: log it once in the wrapper, keep it resident.
            q_in = jnp.log(prior2d.astype(jnp.float32))
            q_spec = pl.BlockSpec((1, C), lambda i: (0, 0))
            log_prior = False
        kern = functools.partial(_hloss_prior_kernel, n_rows=N, tn=tn,
                                 needs_mask=needs_mask, log_prior=log_prior)
        out = pl.pallas_call(
            kern,
            out_shape=out_shape,
            grid=grid,
            in_specs=[x_spec, q_spec],
            out_specs=out_spec,
            compiler_params=compiler_params,
        )(x, q_in)
    return out[0, 0]


def _hloss_ref(x, prior=None):
    # Pure-JAX reference for correctness checking.
    logp = jax.nn.log_softmax(x.astype(jnp.float32), axis=1)
    p = jnp.exp(logp)
    if prior is None:
        b = p * logp
    else:
        b = p * (logp - jnp.log(jnp.reshape(prior.astype(jnp.float32), (-1, x.shape[1]))))
    return jnp.mean(-jnp.sum(b, axis=1))


if __name__ == "__main__":
    key = jax.random.PRNGKey(0)
    k1, k2, k3, k4, k5, k6 = jax.random.split(key, 6)

    # --- case 1: small N (single block), shared (C,) prior --------------------
    N, C = 8, 32
    x = jax.random.normal(k1, (N, C), dtype=jnp.float32)

    out = jax.block_until_ready(hloss(x))
    ref = _hloss_ref(x)
    assert jnp.allclose(out, ref, atol=1e-5, rtol=1e-5), (out, ref)

    prior = jax.nn.softmax(jax.random.normal(k2, (C,), dtype=jnp.float32))
    out_p = jax.block_until_ready(hloss(x, prior))
    ref_p = _hloss_ref(x, prior)
    assert jnp.allclose(out_p, ref_p, atol=1e-5, rtol=1e-5), (out_p, ref_p)

    # --- case 2: ragged N, single block whose rows == N (no pad, no mask), (N,C) prior
    N2, C2 = 13, 32
    x2 = jax.random.normal(k3, (N2, C2), dtype=jnp.float32)

    out2 = jax.block_until_ready(hloss(x2))
    ref2 = _hloss_ref(x2)
    assert jnp.allclose(out2, ref2, atol=1e-5, rtol=1e-5), (out2, ref2)

    prior2 = jax.nn.softmax(jax.random.normal(k4, (N2, C2), dtype=jnp.float32), axis=1)
    out2_p = jax.block_until_ready(hloss(x2, prior2))
    ref2_p = _hloss_ref(x2, prior2)
    assert jnp.allclose(out2_p, ref2_p, atol=1e-5, rtol=1e-5), (out2_p, ref2_p)

    # --- case 3: forced multi-block grid with a partial last block (mask path) -
    N3, C3 = 300, 128
    x3 = jax.random.normal(k5, (N3, C3), dtype=jnp.float32)
    out3 = jax.block_until_ready(hloss(x3, block_rows=64))       # grid=5, 300 % 64 != 0
    ref3 = _hloss_ref(x3)
    assert jnp.allclose(out3, ref3, atol=1e-5, rtol=1e-5), (out3, ref3)

    prior3 = jax.nn.softmax(jax.random.normal(k6, (N3, C3), dtype=jnp.float32), axis=1)
    out3_p = jax.block_until_ready(hloss(x3, prior3, block_rows=64))
    ref3_p = _hloss_ref(x3, prior3)
    assert jnp.allclose(out3_p, ref3_p, atol=1e-5, rtol=1e-5), (out3_p, ref3_p)

    # --- case 4: bf16 input (sublane multiple 16), multi-block + mask ----------
    N4, C4 = 40, 128
    x4 = jax.random.normal(k1, (N4, C4), dtype=jnp.float32).astype(jnp.bfloat16)
    out4 = jax.block_until_ready(hloss(x4, block_rows=16))       # grid=3, 40 % 16 != 0
    ref4 = _hloss_ref(x4)
    assert jnp.allclose(out4, ref4, atol=1e-4, rtol=1e-4), (out4, ref4)

    print("KERNEL_OK")
</pallas_src>

<mosaic_0001>
module attributes {stable_mosaic.version = 11 : i64} {
  func.func @_hloss_kernel(%arg0: i32, %arg1: memref<8x32xf32, #tpu.memory_space<vmem>>, %arg2: memref<1x1xf32, #tpu.memory_space<smem>>) attributes {dimension_semantics = [#tpu.dimension_semantics<arbitrary>], iteration_bounds = array<i64: 1>, scalar_prefetch = 0 : i64, scratch_operands = 0 : i64, tpu.core_type = #tpu.core_type<tc>, window_params = [{transform_indices = @transform_0, window_bounds = array<i64: 8, 32>}, {transform_indices = @transform_1, window_bounds = array<i64: 1, 1>}]} {
    %c0_i32 = arith.constant 0 : i32
    %0 = arith.cmpi eq, %arg0, %c0_i32 : i32
    %1 = arith.extui %0 : i1 to i32
    %c0_i32_0 = arith.constant 0 : i32
    %2 = arith.cmpi ne, %1, %c0_i32_0 : i32
    scf.if %2 {
      %cst_11 = arith.constant 0.000000e+00 : f32
      %c0_12 = arith.constant 0 : index
      %c0_13 = arith.constant 0 : index
      %27 = memref.load %arg2[%c0_12, %c0_13] : memref<1x1xf32, #tpu.memory_space<smem>>
      memref.store %cst_11, %arg2[%c0_12, %c0_13] : memref<1x1xf32, #tpu.memory_space<smem>>
    } else {
    }
    %c0 = arith.constant 0 : index
    %c0_1 = arith.constant 0 : index
    %3 = vector.load %arg1[%c0, %c0_1] : memref<8x32xf32, #tpu.memory_space<vmem>>, vector<8x32xf32>
    %cst = arith.constant dense<0xFF800000> : vector<8xf32>
    %4 = vector.multi_reduction <maximumf>, %3, %cst [1] : vector<8x32xf32> to vector<8xf32>
    %5 = vector.shape_cast %4 : vector<8xf32> to vector<8x1xf32>
    %6 = vector.broadcast %5 : vector<8x1xf32> to vector<8x32xf32>
    %7 = arith.subf %3, %6 : vector<8x32xf32>
    %8 = math.exp %7 : vector<8x32xf32>
    %cst_2 = arith.constant dense<0.000000e+00> : vector<8xf32>
    %9 = vector.multi_reduction <add>, %8, %cst_2 [1] : vector<8x32xf32> to vector<8xf32>
    %10 = vector.shape_cast %9 : vector<8xf32> to vector<8x1xf32>
    %11 = arith.mulf %8, %7 : vector<8x32xf32>
    %cst_3 = arith.constant dense<0.000000e+00> : vector<8xf32>
    %12 = vector.multi_reduction <add>, %11, %cst_3 [1] : vector<8x32xf32> to vector<8xf32>
    %13 = vector.shape_cast %12 : vector<8xf32> to vector<8x1xf32>
    %14 = math.log %10 : vector<8x1xf32>
    %15 = arith.divf %13, %10 : vector<8x1xf32>
    %16 = arith.subf %14, %15 : vector<8x1xf32>
    %c0_4 = arith.constant 0 : index
    %c0_5 = arith.constant 0 : index
    %17 = memref.load %arg2[%c0_4, %c0_5] : memref<1x1xf32, #tpu.memory_space<smem>>
    %18 = vector.shape_cast %16 : vector<8x1xf32> to vector<1x8x1xf32>
    %cst_6 = arith.constant dense<0.000000e+00> : vector<1xf32>
    %19 = vector.multi_reduction <add>, %18, %cst_6 [1, 2] : vector<1x8x1xf32> to vector<1xf32>
    %20 = vector.shape_cast %19 : vector<1xf32> to vector<1x1x1xf32>
    %21 = vector.extract %20[0, 0, 0] : f32 from vector<1x1x1xf32>
    %22 = arith.addf %17, %21 : f32
    %c0_7 = arith.constant 0 : index
    %c0_8 = arith.constant 0 : index
    %23 = memref.load %arg2[%c0_7, %c0_8] : memref<1x1xf32, #tpu.memory_space<smem>>
    memref.store %22, %arg2[%c0_7, %c0_8] : memref<1x1xf32, #tpu.memory_space<smem>>
    %c0_i32_9 = arith.constant 0 : i32
    %24 = arith.cmpi eq, %arg0, %c0_i32_9 : i32
    %25 = arith.extui %24 : i1 to i32
    %c0_i32_10 = arith.constant 0 : i32
    %26 = arith.cmpi ne, %25, %c0_i32_10 : i32
    scf.if %26 {
      %c0_11 = arith.constant 0 : index
      %c0_12 = arith.constant 0 : index
      %27 = memref.load %arg2[%c0_11, %c0_12] : memref<1x1xf32, #tpu.memory_space<smem>>
      %cst_13 = arith.constant 8.000000e+00 : f32
      %28 = arith.divf %27, %cst_13 : f32
      %c0_14 = arith.constant 0 : index
      %c0_15 = arith.constant 0 : index
      %29 = memref.load %arg2[%c0_14, %c0_15] : memref<1x1xf32, #tpu.memory_space<smem>>
      memref.store %28, %arg2[%c0_14, %c0_15] : memref<1x1xf32, #tpu.memory_space<smem>>
    } else {
    }
    return
  }
  func.func @transform_0(%arg0: i32) -> (i32, i32) {
    %c0_i32 = arith.constant 0 : i32
    %c0_i32_0 = arith.constant 0 : i32
    return %arg0, %c0_i32 : i32, i32
  }
  func.func @transform_1(%arg0: i32) -> (i32, i32) {
    %c0_i32 = arith.constant 0 : i32
    %c0_i32_0 = arith.constant 0 : i32
    %c0_i32_1 = arith.constant 0 : i32
    return %c0_i32, %c0_i32_0 : i32, i32
  }
}

</mosaic_0001>

<bundles_post_ra>
// kernel: tpu_custom_call.1
= control target key start
LH: loop header
LB: loop body
LE: loop exit
PB: predicated region body
PF: predicated region fallthrough
CT: control target
= control target key end

     0   :  { %6 = vsyncpa [#allocation3], 0  ;;  %s145_s0 = inlined_call_operand.hbm [shape: f32[8,32], index: 0, kind: input, shape index: {}]   ;;  %s146_s1 = inlined_call_operand.hbm [shape: f32[1,1], index: 1, kind: output, shape index: {}]  }
   0x1   :  { %7 = vsyncpa [#allocation4], 0  ;;  %s127_s6 = smov [#allocation2]  }
   0x2   :  { %s14_s7 = sshll.u32 %s127_s6, 4  ;;  %s15_s7 = int_to_ptr.vmem [resolvable:$true] %s14_s7 }
   0x3   :  { %s103_s8 = scalar_lea.vmem %s15_s7, 128  ;;  %p108_p1 = scmp.lt.s32.totalorder %s15_s7, %s15_s7 }
   0x4   :  { %p104_p0 = scmp.ne.s32.totalorder %s15_s7, %s103_s8  ;;  %p109_p2 = scmp.lt.s32.totalorder %s103_s8, %s103_s8 }
   0x6   :  { %p110_p3 = por %p109_p2, %p108_p1 }
   0x8   :  { %p111_p4 = pnand %p110_p3, %p104_p0 }
   0xa   :  { %114 = shalt.err (!%p111_p4)
}
   0xb   :  { %17 = dma.hbm_to_vmem [thread:$0]  %s145_s0, 128, %s15_s7, [#allocation3]  }
   0xc   :  { %123 = dma.done.wait [#allocation3], 128  }
   0xd   :  { %124 = vsyncadd [#allocation3], 4294967168  ;;  %vm28_vm0 = vcmask 261120   ;;  %v27_v0 = vld [vmem:[#allocation2] sm:$0xff]  ;;  %vm48_vm1 = vcmask 7168   ;;  %s128_s12 = smov [#allocation5]  }
   0xe   :  { %v29_v1 = vsel %vm28_vm0, %v27_v0, -inf }
   0xf   :  { %30 = vmax.xlane.f32.xlu0 %v29_v1 }
  0x98   :  { %v31_v2 = vpop.xlane.xlu0 %30 }
  0x99   :  { %v32_v3 = vsub.f32 %v27_v0, %v31_v2 }
  0x9b   :  { %v33_v4 = vmul.f32 1.442695, %v32_v3 }
  0x9d   :  { %89 = vpow2.f32 %v33_v4 }
  0xaa   :  { %v90_v5 = vpop.eup %89 }
  0xab   :  { %v35_v6 = vsel %vm28_vm0, %v90_v5, 0.0  ;;  %v38_v7 = vmul.f32 %v90_v5, %v32_v3 }
  0xac   :  { %36 = vadd.xlane.f32.xlu0 %v35_v6 }
  0xad   :  { %v39_v8 = vsel %vm28_vm0, %v38_v7, 0.0 }
  0xae   :  { %40 = vadd.xlane.f32.xlu1 %v39_v8 }
 0x135   :  { %v37_v9 = vpop.xlane.xlu0 %36 }
 0x136   :  { %91 = vlog2.f32 %v37_v9 }
 0x137   :  { %93 = vrcp.f32 %v37_v9  ;;  %v41_v13 = vpop.xlane.xlu1 %40 }
 0x143   :  { %v92_v10 = vpop.eup %91 }
 0x144   :  { %v94_v11 = vpop.eup %93  ;;  %v43_v12 = vmul.f32 0.6931472, %v92_v10 }
 0x145   :  { %v45_v14 = vmul.f32 %v94_v11, %v41_v13 }
 0x147   :  { %v46_v15 = vsub.f32 %v43_v12, %v45_v14 }
 0x149   :  { %v49_v16 = vsel %vm48_vm1, %v46_v15, 0.0 }
 0x14a   :  { %50 = vadd.xlane.f32.xlu1 %v49_v16 }
 0x1d3   :  { %v51_v17 = vpop.xlane.xlu1 %50 }
 0x1d4   :  { %v52_v18 = vrot.slane %v51_v17, 4 }
 0x1d6   :  { %v53_v19 = vadd.f32 %v52_v18, %v51_v17 }
 0x1d8   :  { %v54_v20 = vrot.slane %v53_v19, 2 }
 0x1da   :  { %v55_v21 = vadd.f32 %v54_v20, %v53_v19 }
 0x1dc   :  { %v56_v22 = vrot.slane %v55_v21, 1 }
 0x1de   :  { %v57_v23 = vadd.f32 %v56_v22, %v55_v21 }
 0x1e0   :  { %84 = vpush %v57_v23 }
 0x211   :  { %s85_s0 = spop %84 }
 0x212   :  { %s68_s11 = smul.f32 0.125, %s85_s0 }
 0x214   :  { %69 = sst [smem:[#allocation5]] %s68_s11 }
 0x215   :  { %77 = dma.smem_to_hbm %s128_s12, 16, %s146_s1, [#allocation4]  }
 0x216   :  { %125 = dma.done.wait [#allocation4], 16  }
 0x217   :  { %126 = vsyncadd [#allocation4], 4294967280 }
 0x218   :  { %81 = sfence }
 0x219   :  { %82 = vsyncpa [#allocation3], 1 }
 0x21a   :  { %83 = vsyncpa [#allocation4], 1 }

</bundles_post_ra>
